<compile_context>
chip_gen: v7x
topology: tpu7x:2x2x1
jax: 0.10.0
libtpu: 0.0.40
codegen_flags: <defaults>
</compile_context>

<pallas_src>
import jax
import jax.numpy as jnp
from jax.experimental import pallas as pl
from jax.experimental.pallas import tpu as pltpu


LANE = 128
# Conservative, cross-generation budgets for double-buffered pipeline state.
# v7x has 64 MiB/TC; we target ~40 MiB and leave headroom for compiler scratch.
_TILED_VMEM_BUDGET = 40 * 1024 * 1024
_FAST_PATH_VMEM_BUDGET = 24 * 1024 * 1024


def _round_up(x, m):
    return (x + m - 1) // m * m


def _vmem_limit(need_bytes):
    # actual need + headroom, never above v7x's 64 MiB physical VMEM
    return int(min(max(int(need_bytes * 1.5), 32 * 1024 * 1024), 60 * 1024 * 1024))


def _pick_agg_tiles(n_pad, c_out_pad, budget):
    """(tm, tn, tk) for kernel 2; prefer tn == c_out_pad so A streams once."""
    tn_opts = [c_out_pad] + [t for t in (1024, 512, 256, 128)
                             if t < c_out_pad and c_out_pad % t == 0]
    tm_all = [t for t in (1024, 512, 256, 128) if n_pad % t == 0] or [n_pad]
    # keep >=2 row blocks so both v7x TensorCores get work when gn == 1
    tm_opts = [t for t in tm_all if n_pad // t >= 2] or tm_all
    tk_opts = [t for t in (2048, 1024, 512, 256, 128) if n_pad % t == 0] or [n_pad]
    for tn in tn_opts:
        for tm in tm_opts:
            for tk in tk_opts:
                need = 2 * (tm * tk * 2 + tk * tn * 2 + tn * 4) + 2 * tm * tn * 4
                if need <= budget:
                    return tm, tn, tk
    return tm_all[-1], tn_opts[-1], tk_opts[-1]


def _pick_xw_row_tile(n_pad, c_in_pad, c_out_pad, budget):
    opts = [t for t in (1024, 512, 256, 128) if n_pad % t == 0] or [n_pad]
    for tm in opts:
        need = 2 * (tm * c_in_pad * 2 + tm * c_out_pad * 2) + 2 * c_in_pad * c_out_pad * 2
        if need <= budget:
            return tm
    return opts[-1]


# ----------------------------- kernels ------------------------------------- #

def _gcn_fused_kernel(a_ref, x_ref, w_ref, b_ref, o_ref):
    # whole problem resident in VMEM: relu(A @ (X @ W) + b)
    xw = jnp.dot(x_ref[...], w_ref[...],
                 preferred_element_type=jnp.float32).astype(jnp.bfloat16)
    out = jnp.dot(a_ref[...], xw, preferred_element_type=jnp.float32)
    o_ref[...] = jnp.maximum(out + b_ref[...], 0.0).astype(o_ref.dtype)


def _xw_kernel(x_ref, w_ref, o_ref):
    # feature transform X @ W (MXU), f32 accumulation, bf16 result for kernel 2
    o_ref[...] = jnp.dot(
        x_ref[...], w_ref[...], preferred_element_type=jnp.float32
    ).astype(o_ref.dtype)


def _gcn_agg_kernel(a_ref, xw_ref, b_ref, o_ref):
    # out[i, j] = relu( sum_k A[i, k] @ XW[k, j] + b[j] )
    # f32 output block is resident across k (its index map ignores k), so we
    # accumulate directly into it -- no separate scratch, no epilogue copy.
    k = pl.program_id(2)

    @pl.when(k == 0)
    def _():
        o_ref[...] = jnp.zeros_like(o_ref)

    o_ref[...] += jnp.dot(
        a_ref[...], xw_ref[...], preferred_element_type=jnp.float32)

    @pl.when(k == pl.num_programs(2) - 1)
    def _():
        # bias + ReLU epilogue once per output tile (not per K step)
        o_ref[...] = jnp.maximum(o_ref[...] + b_ref[...], 0.0).astype(o_ref.dtype)


# ----------------------------- wrapper ------------------------------------- #

def gnn_layer_forward(x, a_hat, weight, bias, *, force_tiled=False, tiles=None):
    """relu(A_hat @ X @ W + b) via fused, tiled Pallas calls.

    a_hat may be passed already padded to (round_up(n,128), round_up(n,128))
    (preferred: avoids a standalone padded-copy of the largest tensor).
    """
    n, c_in = x.shape
    c_out = weight.shape[1]

    c_in_pad = _round_up(c_in, LANE)
    c_out_pad = _round_up(c_out, LANE)
    n_pad = _round_up(n, LANE)          # rows padded to 128 only (not to tm)

    # --- pad + cast inputs (bf16 operands; zero padding keeps math exact) ---
    if a_hat.shape == (n_pad, n_pad):
        a_p = a_hat.astype(jnp.bfloat16)          # built padded: no extra copy
    else:
        a_p = jnp.zeros((n_pad, n_pad), jnp.bfloat16).at[:n, :n].set(
            a_hat.astype(jnp.bfloat16))
    x_p = jnp.zeros((n_pad, c_in_pad), jnp.bfloat16).at[:n, :c_in].set(
        x.astype(jnp.bfloat16))
    w_p = jnp.zeros((c_in_pad, c_out_pad), jnp.bfloat16).at[:c_in, :c_out].set(
        weight.astype(jnp.bfloat16))
    b_p = jnp.zeros((1, c_out_pad), jnp.float32).at[0, :c_out].set(
        bias.astype(jnp.float32))

    # ------------------- fast path: whole problem in VMEM -------------------
    fast_bytes = (n_pad * n_pad * 2 + n_pad * c_in_pad * 2
                  + c_in_pad * c_out_pad * 2 + c_out_pad * 4
                  + n_pad * c_out_pad * (2 + 4))
    if not force_tiled and fast_bytes <= _FAST_PATH_VMEM_BUDGET:
        out_p = pl.pallas_call(
            _gcn_fused_kernel,
            out_shape=jax.ShapeDtypeStruct((n_pad, c_out_pad), jnp.float32),
            grid=(1,),
            in_specs=[
                pl.BlockSpec((n_pad, n_pad), lambda i: (0, 0)),
                pl.BlockSpec((n_pad, c_in_pad), lambda i: (0, 0)),
                pl.BlockSpec((c_in_pad, c_out_pad), lambda i: (0, 0)),
                pl.BlockSpec((1, c_out_pad), lambda i: (0, 0)),
            ],
            out_specs=pl.BlockSpec((n_pad, c_out_pad), lambda i: (0, 0)),
            compiler_params=pltpu.CompilerParams(
                dimension_semantics=("arbitrary",),
                vmem_limit_bytes=_vmem_limit(fast_bytes)),
            cost_estimate=pl.CostEstimate(
                flops=2 * n_pad * c_in_pad * c_out_pad
                      + 2 * n_pad * n_pad * c_out_pad,
                transcendentals=0,
                bytes_accessed=fast_bytes),
        )(a_p, x_p, w_p, b_p)
        return out_p[:n, :c_out]

    # --------------------------- tiled path ---------------------------------
    if tiles is None:
        tm, tn, tk = _pick_agg_tiles(n_pad, c_out_pad, _TILED_VMEM_BUDGET)
    else:
        tm, tn, tk = tiles
    tm1 = _pick_xw_row_tile(n_pad, c_in_pad, c_out_pad, _TILED_VMEM_BUDGET)

    gm, gn, gk = n_pad // tm, c_out_pad // tn, n_pad // tk
    gm1 = n_pad // tm1

    # -------- kernel 1: XW = X @ W (computed once, bf16, row-tiled) ----------
    xw_need = 2 * (tm1 * c_in_pad * 2 + tm1 * c_out_pad * 2) + 2 * c_in_pad * c_out_pad * 2
    xw = pl.pallas_call(
        _xw_kernel,
        out_shape=jax.ShapeDtypeStruct((n_pad, c_out_pad), jnp.bfloat16),
        grid=(gm1,),
        in_specs=[
            pl.BlockSpec((tm1, c_in_pad), lambda i: (i, 0)),         # X tile
            pl.BlockSpec((c_in_pad, c_out_pad), lambda i: (0, 0)),   # W (resident)
        ],
        out_specs=pl.BlockSpec((tm1, c_out_pad), lambda i: (i, 0)),
        compiler_params=pltpu.CompilerParams(
            dimension_semantics=("parallel",),
            vmem_limit_bytes=_vmem_limit(xw_need)),
        cost_estimate=pl.CostEstimate(
            flops=2 * n_pad * c_in_pad * c_out_pad,
            transcendentals=0,
            bytes_accessed=(n_pad * c_in_pad + c_in_pad * c_out_pad
                            + n_pad * c_out_pad) * 2),
    )(x_p, w_p)

    # ---- kernel 2: out = relu(A_hat @ XW + b), tiled (rows, cols, K-last) ----
    agg_need = 2 * (tm * tk * 2 + tk * tn * 2 + tn * 4) + 2 * tm * tn * 4
    out_p = pl.pallas_call(
        _gcn_agg_kernel,
        out_shape=jax.ShapeDtypeStruct((n_pad, c_out_pad), jnp.float32),
        grid=(gm, gn, gk),
        in_specs=[
            pl.BlockSpec((tm, tk), lambda i, j, k: (i, k)),   # A_hat tile
            pl.BlockSpec((tk, tn), lambda i, j, k: (k, j)),   # XW tile
            pl.BlockSpec((1, tn), lambda i, j, k: (0, j)),    # bias tile
        ],
        out_specs=pl.BlockSpec((tm, tn), lambda i, j, k: (i, j)),
        compiler_params=pltpu.CompilerParams(
            dimension_semantics=("parallel", "parallel", "arbitrary"),
            vmem_limit_bytes=_vmem_limit(agg_need)),
        cost_estimate=pl.CostEstimate(
            flops=2 * n_pad * n_pad * c_out_pad,
            transcendentals=0,
            bytes_accessed=(gn * n_pad * n_pad * 2            # A re-read per col block
                            + gm * n_pad * c_out_pad * 2      # XW re-read per row block
                            + n_pad * c_out_pad * 4           # f32 output write
                            + gm * gn * c_out_pad * 4)),      # bias re-reads
    )(a_p, xw, b_p)

    return out_p[:n, :c_out]


# ----------------------- glue (plain JAX, not a kernel) --------------------- #

def build_normalized_adjacency(edge_index, num_nodes, pad_to=None):
    """Dense A_hat = D^-1/2 (A + I) D^-1/2 from a [2, E] edge_index.

    When pad_to is given, the matrix is built directly at the padded shape
    (padded rows/cols end up all-zero), avoiding a separate padded copy.
    """
    n_total = num_nodes if pad_to is None else max(int(pad_to), num_nodes)
    src, dst = edge_index[0], edge_index[1]
    adj = jnp.zeros((n_total, n_total), dtype=jnp.float32)
    adj = adj.at[dst, src].set(1.0)                 # message src -> dst
    diag = jnp.arange(num_nodes)
    adj = adj.at[diag, diag].add(1.0)               # self-loops (real nodes only)
    deg = adj.sum(axis=1)
    d_inv_sqrt = jnp.where(deg > 0, 1.0 / jnp.sqrt(deg), 0.0)
    return d_inv_sqrt[:, None] * adj * d_inv_sqrt[None, :]


def _ring_edge_index(num_nodes):
    idx = jnp.arange(num_nodes)
    src = jnp.concatenate([idx, (idx + 1) % num_nodes])
    dst = jnp.concatenate([(idx + 1) % num_nodes, idx])
    return jnp.stack([src, dst], axis=0)


def _bf16_reference(x, a_hat_real, weight, bias):
    # bf16-matched reference (kernels use bf16 operands with f32 accumulation,
    # and a bf16 XW intermediate)
    x_bf = x.astype(jnp.bfloat16).astype(jnp.float32)
    w_bf = weight.astype(jnp.bfloat16).astype(jnp.float32)
    a_bf = a_hat_real.astype(jnp.bfloat16).astype(jnp.float32)
    xw_bf = (x_bf @ w_bf).astype(jnp.bfloat16).astype(jnp.float32)
    return jnp.maximum(a_bf @ xw_bf + bias[None, :], 0.0)


if __name__ == "__main__":
    key = jax.random.PRNGKey(0)
    k_x1, k_w1, k_x2, k_w2 = jax.random.split(key, 4)

    # --------- test 1: demo-sized graph -> single fused fast-path kernel -----
    num_nodes, in_channels, out_channels = 64, 32, 32
    x = jax.random.normal(k_x1, (num_nodes, in_channels), dtype=jnp.float32)
    edge_index = _ring_edge_index(num_nodes)
    limit = (6.0 / (in_channels + out_channels)) ** 0.5
    weight = jax.random.uniform(k_w1, (in_channels, out_channels),
                                minval=-limit, maxval=limit, dtype=jnp.float32)
    bias = jnp.zeros((out_channels,), dtype=jnp.float32)

    n_pad = _round_up(num_nodes, LANE)
    a_hat = build_normalized_adjacency(edge_index, num_nodes, pad_to=n_pad)

    out = gnn_layer_forward(x, a_hat, weight, bias)
    out = jax.block_until_ready(out)

    ref = _bf16_reference(x, a_hat[:num_nodes, :num_nodes], weight, bias)
    assert out.shape == (num_nodes, out_channels)
    assert jnp.allclose(out, ref, atol=2e-2, rtol=2e-2), (
        float(jnp.max(jnp.abs(out - ref))))

    # --------- test 2: force the tiled two-kernel path (exercises K accum) ---
    num_nodes2, in_channels2, out_channels2 = 250, 48, 80
    x2 = jax.random.normal(k_x2, (num_nodes2, in_channels2), dtype=jnp.float32)
    edge_index2 = _ring_edge_index(num_nodes2)
    limit2 = (6.0 / (in_channels2 + out_channels2)) ** 0.5
    weight2 = jax.random.uniform(k_w2, (in_channels2, out_channels2),
                                 minval=-limit2, maxval=limit2, dtype=jnp.float32)
    bias2 = jnp.linspace(-0.1, 0.1, out_channels2, dtype=jnp.float32)

    n_pad2 = _round_up(num_nodes2, LANE)
    a_hat2 = build_normalized_adjacency(edge_index2, num_nodes2, pad_to=n_pad2)

    out2 = gnn_layer_forward(x2, a_hat2, weight2, bias2,
                             force_tiled=True, tiles=(128, 128, 128))
    out2 = jax.block_until_ready(out2)

    ref2 = _bf16_reference(x2, a_hat2[:num_nodes2, :num_nodes2], weight2, bias2)
    assert out2.shape == (num_nodes2, out_channels2)
    assert jnp.allclose(out2, ref2, atol=2e-2, rtol=2e-2), (
        float(jnp.max(jnp.abs(out2 - ref2))))

    print("KERNEL_OK")
</pallas_src>

<mosaic_0001>
module attributes {stable_mosaic.version = 11 : i64} {
  func.func @_gcn_fused_kernel(%arg0: i32, %arg1: memref<128x128xbf16, #tpu.memory_space<vmem>>, %arg2: memref<128x128xbf16, #tpu.memory_space<vmem>>, %arg3: memref<128x128xbf16, #tpu.memory_space<vmem>>, %arg4: memref<1x128xf32, #tpu.memory_space<vmem>>, %arg5: memref<128x128xf32, #tpu.memory_space<vmem>>) attributes {dimension_semantics = [#tpu.dimension_semantics<arbitrary>], iteration_bounds = array<i64: 1>, scalar_prefetch = 0 : i64, scratch_operands = 0 : i64, tpu.core_type = #tpu.core_type<tc>, window_params = [{pipeline_mode = #tpu.pipeline_mode<synchronous>, transform_indices = @transform_0, window_bounds = array<i64: 128, 128>}, {pipeline_mode = #tpu.pipeline_mode<synchronous>, transform_indices = @transform_1, window_bounds = array<i64: 128, 128>}, {pipeline_mode = #tpu.pipeline_mode<synchronous>, transform_indices = @transform_2, window_bounds = array<i64: 128, 128>}, {pipeline_mode = #tpu.pipeline_mode<synchronous>, transform_indices = @transform_3, window_bounds = array<i64: 1, 128>}, {pipeline_mode = #tpu.pipeline_mode<synchronous>, transform_indices = @transform_4, window_bounds = array<i64: 128, 128>}]} {
    %c0 = arith.constant 0 : index
    %c0_0 = arith.constant 0 : index
    %0 = vector.load %arg2[%c0, %c0_0] : memref<128x128xbf16, #tpu.memory_space<vmem>>, vector<128x128xbf16>
    %c0_1 = arith.constant 0 : index
    %c0_2 = arith.constant 0 : index
    %1 = vector.load %arg3[%c0_1, %c0_2] : memref<128x128xbf16, #tpu.memory_space<vmem>>, vector<128x128xbf16>
    %cst = arith.constant dense<0.000000e+00> : vector<128x128xf32>
    %2 = tpu.matmul %0, %1, %cst {dimension_numbers = #tpu.dot_dimension_numbers<[1], [0], [0], [1], [0, 0, 1, 1], [], []>} : vector<128x128xbf16>, vector<128x128xbf16>, vector<128x128xf32> -> vector<128x128xf32>
    %3 = arith.truncf %2 : vector<128x128xf32> to vector<128x128xbf16>
    %c0_3 = arith.constant 0 : index
    %c0_4 = arith.constant 0 : index
    %4 = vector.load %arg1[%c0_3, %c0_4] : memref<128x128xbf16, #tpu.memory_space<vmem>>, vector<128x128xbf16>
    %cst_5 = arith.constant dense<0.000000e+00> : vector<128x128xf32>
    %5 = tpu.matmul %4, %3, %cst_5 {dimension_numbers = #tpu.dot_dimension_numbers<[1], [0], [0], [1], [0, 0, 1, 1], [], []>} : vector<128x128xbf16>, vector<128x128xbf16>, vector<128x128xf32> -> vector<128x128xf32>
    %c0_6 = arith.constant 0 : index
    %c0_7 = arith.constant 0 : index
    %6 = vector.load %arg4[%c0_6, %c0_7] : memref<1x128xf32, #tpu.memory_space<vmem>>, vector<1x128xf32>
    %7 = vector.broadcast %6 : vector<1x128xf32> to vector<128x128xf32>
    %8 = arith.addf %5, %7 : vector<128x128xf32>
    %cst_8 = arith.constant 0.000000e+00 : f32
    %9 = vector.broadcast %cst_8 : f32 to vector<128x128xf32>
    %10 = arith.maximumf %8, %9 : vector<128x128xf32>
    %c0_9 = arith.constant 0 : index
    %c0_10 = arith.constant 0 : index
    %11 = vector.load %arg5[%c0_9, %c0_10] : memref<128x128xf32, #tpu.memory_space<vmem>>, vector<128x128xf32>
    tpu.vector_store %arg5[%c0_9, %c0_10], %10 {strides = array<i32>} : memref<128x128xf32, #tpu.memory_space<vmem>>, vector<128x128xf32>,
    return
  }
  func.func @transform_0(%arg0: i32) -> (i32, i32) {
    %c0_i32 = arith.constant 0 : i32
    %c0_i32_0 = arith.constant 0 : i32
    %c0_i32_1 = arith.constant 0 : i32
    return %c0_i32, %c0_i32_0 : i32, i32
  }
  func.func @transform_1(%arg0: i32) -> (i32, i32) {
    %c0_i32 = arith.constant 0 : i32
    %c0_i32_0 = arith.constant 0 : i32
    %c0_i32_1 = arith.constant 0 : i32
    return %c0_i32, %c0_i32_0 : i32, i32
  }
  func.func @transform_2(%arg0: i32) -> (i32, i32) {
    %c0_i32 = arith.constant 0 : i32
    %c0_i32_0 = arith.constant 0 : i32
    %c0_i32_1 = arith.constant 0 : i32
    return %c0_i32, %c0_i32_0 : i32, i32
  }
  func.func @transform_3(%arg0: i32) -> (i32, i32) {
    %c0_i32 = arith.constant 0 : i32
    %c0_i32_0 = arith.constant 0 : i32
    %c0_i32_1 = arith.constant 0 : i32
    return %c0_i32, %c0_i32_0 : i32, i32
  }
  func.func @transform_4(%arg0: i32) -> (i32, i32) {
    %c0_i32 = arith.constant 0 : i32
    %c0_i32_0 = arith.constant 0 : i32
    %c0_i32_1 = arith.constant 0 : i32
    return %c0_i32, %c0_i32_0 : i32, i32
  }
}

</mosaic_0001>

<bundles_post_ra>
// kernel: tpu_custom_call.1
= control target key start
LH: loop header
LB: loop body
LE: loop exit
PB: predicated region body
PF: predicated region fallthrough
CT: control target
= control target key end

     0   :  { %9 = vsyncpa [#allocation3], 0  ;;  %s858_s0 = inlined_call_operand.hbm [shape: bf16[128,128], index: 0, kind: input, shape index: {}]   ;;  %s859_s1 = inlined_call_operand.hbm [shape: bf16[128,128], index: 1, kind: input, shape index: {}]   ;;  %s860_s2 = inlined_call_operand.hbm [shape: bf16[128,128], index: 2, kind: input, shape index: {}]   ;;  %s861_s3 = inlined_call_operand.vmem [shape: f32[1,128], index: 3, kind: input, shape index: {}]   ;;  %s862_s4 = inlined_call_operand.hbm [shape: f32[128,128], index: 4, kind: output, shape index: {}]  }
   0x1   :  { %10 = vsyncpa [#allocation6], 0 }
   0x2   :  { %11 = vsyncpa [#allocation4], 0  ;;  %s758_s15 = smov [#allocation5]   ;;  %s759_s17 = smov [#allocation2]  }
   0x3   :  { %s29_s16 = sshll.u32 %s758_s15, 4  ;;  %s17_s18 = sshll.u32 %s759_s17, 4  ;;  %s30_s16 = int_to_ptr.vmem [resolvable:$true] %s29_s16  ;;  %s791_s18 = int_to_ptr.vmem [resolvable:$true] %s17_s18 }
   0x4   :  { %s664_s21 = scalar_lea.hbm %s859_s1, 1024 }
   0x5   :  { %p665_p0 = scmp.ne.s32.totalorder %s859_s1, %s664_s21  ;;  %p668_p1 = scmp.lt.u32.totalorder %s664_s21, %s859_s1 }
   0x7   :  { %p670_p2 = pnand %p668_p1, %p665_p0 }
   0x9   :  { %673 = shalt.err (!%p670_p2)
}
   0xa   :  { %s674_s26 = scalar_lea.vmem %s30_s16, 1024  ;;  %p679_p4 = scmp.lt.s32.totalorder %s30_s16, %s30_s16 }
   0xb   :  { %p675_p3 = scmp.ne.s32.totalorder %s30_s16, %s674_s26  ;;  %p680_p5 = scmp.lt.s32.totalorder %s674_s26, %s674_s26 }
   0xd   :  { %p681_p6 = por %p680_p5, %p679_p4 }
   0xf   :  { %p682_p7 = pnand %p681_p6, %p675_p3 }
  0x11   :  { %685 = shalt.err (!%p682_p7)
}
  0x12   :  { %s760_s27 = smov 64   ;;  %s761_s28 = smov 4  }
  0x13   :  { %35 = dma.hbm_to_vmem [thread:$0]  %s859_s1, 1024, %s30_s16, [#allocation6], %s760_s27, %s760_s27, %s761_s28  }
  0x14   :  { %s686_s7 = scalar_lea.hbm %s858_s0, 1024 }
  0x15   :  { %p687_p8 = scmp.ne.s32.totalorder %s858_s0, %s686_s7  ;;  %p690_p9 = scmp.lt.u32.totalorder %s686_s7, %s858_s0 }
  0x17   :  { %p692_p10 = pnand %p690_p9, %p687_p8 }
  0x19   :  { %695 = shalt.err (!%p692_p10)
}
  0x1a   :  { %s696_s12 = scalar_lea.vmem %s791_s18, 1024  ;;  %p701_p12 = scmp.lt.s32.totalorder %s791_s18, %s791_s18 }
  0x1b   :  { %p697_p11 = scmp.ne.s32.totalorder %s791_s18, %s696_s12  ;;  %p702_p13 = scmp.lt.s32.totalorder %s696_s12, %s696_s12 }
  0x1d   :  { %p703_p0 = por %p702_p13, %p701_p12 }
  0x1f   :  { %p704_p1 = pnand %p703_p0, %p697_p11 }
  0x21   :  { %707 = shalt.err (!%p704_p1)
}
  0x22   :  { %23 = dma.hbm_to_vmem [thread:$0]  %s858_s0, 1024, %s791_s18, [#allocation3], %s760_s27, %s760_s27, %s761_s28  }
  0x23   :  { %s762_s14 = smov [#allocation7]   ;;  %s708_s19 = scalar_lea.hbm %s860_s2, 1024 }
  0x24   :  { %s41_s15 = sshll.u32 %s762_s14, 4  ;;  %p709_p2 = scmp.ne.s32.totalorder %s860_s2, %s708_s19  ;;  %s42_s15 = int_to_ptr.vmem [resolvable:$true] %s41_s15 }
  0x25   :  { %p712_p3 = scmp.lt.u32.totalorder %s708_s19, %s860_s2 }
  0x27   :  { %p714_p4 = pnand %p712_p3, %p709_p2 }
  0x29   :  { %717 = shalt.err (!%p714_p4)
}
  0x2a   :  { %s718_s24 = scalar_lea.vmem %s42_s15, 1024  ;;  %p723_p6 = scmp.lt.s32.totalorder %s42_s15, %s42_s15 }
  0x2b   :  { %p719_p5 = scmp.ne.s32.totalorder %s42_s15, %s718_s24  ;;  %p724_p7 = scmp.lt.s32.totalorder %s718_s24, %s718_s24 }
  0x2d   :  { %p725_p8 = por %p724_p7, %p723_p6 }
  0x2f   :  { %p726_p9 = pnand %p725_p8, %p719_p5 }
  0x31   :  { %729 = shalt.err (!%p726_p9)
}
  0x32   :  { %47 = dma.hbm_to_vmem [thread:$0]  %s860_s2, 1024, %s42_s15, [#allocation6], %s760_s27, %s760_s27, %s761_s28  }
  0x33   :  { %752 = dma.done.wait [#allocation3], 1024  }
  0x34   :  { %753 = vsyncadd [#allocation3], 4294966272 }
  0x35   :  { %754 = dma.done.wait [#allocation6], 2048  }
  0x36   :  { %755 = vsyncadd [#allocation6], 4294965248  ;;  %v640_v0 = vld [vmem:[#allocation7] sm:$0xff]   ;;  %v641_v1 = vld [vmem:[#allocation7 + $0x8] sm:$0xff]  }
  0x37   :  { %568 = vmatprep.subr.bf16.mxu0 %v640_v0  ;;  %v642_v2 = vld [vmem:[#allocation7 + $0x10] sm:$0xff]   ;;  %v643_v3 = vld [vmem:[#allocation7 + $0x18] sm:$0xff]   ;;  %v648_v4 = vld [vmem:[#allocation5] sm:$0xff]  }
  0x38   :  { %569 = vmatpush3.bf16.msra.mxu0 %v640_v0  ;;  %584 = vmatprep.mubr.bf16.mxu0 %v648_v4  ;;  %v644_v5 = vld [vmem:[#allocation7 + $0x20] sm:$0xff]   ;;  %v645_v6 = vld [vmem:[#allocation7 + $0x28] sm:$0xff]   ;;  %v646_v7 = vld [vmem:[#allocation7 + $0x30] sm:$0xff]  }
  0x39   :  { %570 = vmatprep.subr.bf16.mxu0 %v641_v1  ;;  %v647_v8 = vld [vmem:[#allocation7 + $0x38] sm:$0xff]   ;;  %v649_v9 = vld [vmem:[#allocation5 + $0x8] sm:$0xff]   ;;  %v650_v10 = vld [vmem:[#allocation5 + $0x10] sm:$0xff]  }
  0x3a   :  { %v651_v11 = vld [vmem:[#allocation5 + $0x18] sm:$0xff]   ;;  %v652_v12 = vld [vmem:[#allocation5 + $0x20] sm:$0xff]   ;;  %v653_v13 = vld [vmem:[#allocation5 + $0x28] sm:$0xff]  }
  0x3b   :  { %v654_v14 = vld [vmem:[#allocation5 + $0x30] sm:$0xff]   ;;  %v655_v15 = vld [vmem:[#allocation5 + $0x38] sm:$0xff]   ;;  %v656_v16 = vld [vmem:[#allocation2] sm:$0xff]  }
  0x3c   :  { %571 = vmatpush3.bf16.msra.mxu0 %v641_v1  ;;  %616 = vmatprep.mubr.bf16.mxu1 %v656_v16  ;;  %v657_v41 = vld [vmem:[#allocation2 + $0x8] sm:$0xff]   ;;  %v658_v42 = vld [vmem:[#allocation2 + $0x10] sm:$0xff]   ;;  %v659_v43 = vld [vmem:[#allocation2 + $0x18] sm:$0xff]  }
  0x3d   :  { %572 = vmatprep.subr.bf16.mxu0 %v642_v2  ;;  %v660_v44 = vld [vmem:[#allocation2 + $0x20] sm:$0xff]   ;;  %v661_v45 = vld [vmem:[#allocation2 + $0x28] sm:$0xff]   ;;  %v662_v46 = vld [vmem:[#allocation2 + $0x30] sm:$0xff]  }
  0x3e   :  { %v663_v47 = vld [vmem:[#allocation2 + $0x38] sm:$0xff]   ;;  %v527_v48 = vld [vmem:[%s861_s3] ss:$0 sm:$0xff]  ;;  %s763_s3 = smov [#allocation8]  }
  0x3f   :  { %s498_s26 = sshll.u32 %s763_s3, 4  ;;  %s499_s26 = int_to_ptr.vmem [resolvable:$true] %s498_s26 }
  0x40   :  { %573 = vmatpush3.bf16.msra.mxu0 %v642_v2  ;;  %s730_s27 = scalar_lea.vmem %s499_s26, 2048  ;;  %p735_p11 = scmp.lt.s32.totalorder %s499_s26, %s499_s26 }
  0x41   :  { %574 = vmatprep.subr.bf16.mxu0 %v643_v3  ;;  %p731_p10 = scmp.ne.s32.totalorder %s499_s26, %s730_s27  ;;  %p736_p12 = scmp.lt.s32.totalorder %s730_s27, %s730_s27 }
  0x43   :  { %p737_p13 = por %p736_p12, %p735_p11 }
  0x44   :  { %575 = vmatpush3.bf16.msra.mxu0 %v643_v3 }
  0x45   :  { %576 = vmatprep.subr.bf16.mxu0 %v644_v5  ;;  %p738_p0 = pnand %p737_p13, %p731_p10 }
  0x48   :  { %577 = vmatpush3.bf16.msra.mxu0 %v644_v5 }
  0x49   :  { %578 = vmatprep.subr.bf16.mxu0 %v645_v6 }
  0x4c   :  { %579 = vmatpush3.bf16.msra.mxu0 %v645_v6 }
  0x4d   :  { %580 = vmatprep.subr.bf16.mxu0 %v646_v7 }
  0x50   :  { %581 = vmatpush3.bf16.msra.mxu0 %v646_v7 }
  0x51   :  { %582 = vmatprep.subr.bf16.mxu0 %v647_v8 }
  0x54   :  { %583 = vmatpush3.bf16.msra.mxu0 %v647_v8 }
  0x57   :  { %585 = vmatmul.mubr.bf16.vlgmr.msra.gmra.mrb[0].mxu0 %v649_v9 }
  0x58   :  { %588 = vmatprep.mubr.bf16.mxu0 %v650_v10 }
  0x5f   :  { %589 = vmatmul.mubr.bf16.gmra.mrb[4].mxu0 %v651_v11 }
  0x60   :  { %592 = vmatprep.mubr.bf16.mxu0 %v652_v12 }
  0x67   :  { %593 = vmatmul.mubr.bf16.gmra.mrb[8].mxu0 %v653_v13 }
  0x68   :  { %596 = vmatprep.mubr.bf16.mxu0 %v654_v14 }
  0x6f   :  { %597 = vmatmul.mubr.bf16.gmra.mrb[12].mxu0 %v655_v15 }
 0x12a   :  { %v586_v17 = vpop.f32.mrb[0].mxu0 }
 0x12b   :  { %v222_v18 = vpop.f32.mrb[1].mxu0 }
 0x12c   :  { %v587_v19 = vpop.f32.mrb[2].mxu0 }
 0x12d   :  { %v286_v20 = vpack.c.bf16 %v587_v19, %v586_v17  ;;  %v225_v21 = vpop.f32.mrb[3].mxu0 }
 0x12e   :  { %v285_v22 = vpack.c.bf16 %v225_v21, %v222_v18 }
 0x130   :  { %600 = vmatprep.subr.bf16.mxu1 %v285_v22 }
 0x131   :  { %601 = vmatpush3.bf16.msra.mxu1 %v285_v22 }
 0x132   :  { %v590_v23 = vpop.f32.mrb[4].mxu0  ;;  %602 = vmatprep.subr.bf16.mxu1 %v286_v20 }
 0x133   :  { %v238_v24 = vpop.f32.mrb[5].mxu0 }
 0x134   :  { %v591_v25 = vpop.f32.mrb[6].mxu0 }
 0x135   :  { %v288_v26 = vpack.c.bf16 %v591_v25, %v590_v23  ;;  %v241_v27 = vpop.f32.mrb[7].mxu0  ;;  %603 = vmatpush3.bf16.msra.mxu1 %v286_v20 }
 0x136   :  { %v287_v28 = vpack.c.bf16 %v241_v27, %v238_v24 }
 0x138   :  { %604 = vmatprep.subr.bf16.mxu1 %v287_v28 }
 0x139   :  { %605 = vmatpush3.bf16.msra.mxu1 %v287_v28 }
 0x13a   :  { %v594_v29 = vpop.f32.mrb[8].mxu0  ;;  %606 = vmatprep.subr.bf16.mxu1 %v288_v26 }
 0x13b   :  { %v254_v30 = vpop.f32.mrb[9].mxu0 }
 0x13c   :  { %v595_v31 = vpop.f32.mrb[10].mxu0 }
 0x13d   :  { %v290_v32 = vpack.c.bf16 %v595_v31, %v594_v29  ;;  %v257_v33 = vpop.f32.mrb[11].mxu0  ;;  %607 = vmatpush3.bf16.msra.mxu1 %v288_v26 }
 0x13e   :  { %v289_v34 = vpack.c.bf16 %v257_v33, %v254_v30 }
 0x140   :  { %608 = vmatprep.subr.bf16.mxu1 %v289_v34 }
 0x141   :  { %609 = vmatpush3.bf16.msra.mxu1 %v289_v34 }
 0x142   :  { %v598_v35 = vpop.f32.mrb[12].mxu0  ;;  %610 = vmatprep.subr.bf16.mxu1 %v290_v32 }
 0x143   :  { %v270_v36 = vpop.f32.mrb[13].mxu0 }
 0x144   :  { %v599_v37 = vpop.f32.mrb[14].mxu0 }
 0x145   :  { %v292_v38 = vpack.c.bf16 %v599_v37, %v598_v35  ;;  %v273_v39 = vpop.f32.mrb[15].mxu0  ;;  %611 = vmatpush3.bf16.msra.mxu1 %v290_v32 }
 0x146   :  { %v291_v40 = vpack.c.bf16 %v273_v39, %v270_v36 }
 0x148   :  { %612 = vmatprep.subr.bf16.mxu1 %v291_v40 }
 0x149   :  { %613 = vmatpush3.bf16.msra.mxu1 %v291_v40 }
 0x14a   :  { %614 = vmatprep.subr.bf16.mxu1 %v292_v38 }
 0x14d   :  { %615 = vmatpush3.bf16.msra.mxu1 %v292_v38 }
 0x150   :  { %617 = vmatmul.mubr.bf16.vlgmr.msra.gmra.mrb[0].mxu1 %v657_v41 }
 0x151   :  { %620 = vmatprep.mubr.bf16.mxu1 %v658_v42 }
 0x158   :  { %621 = vmatmul.mubr.bf16.gmra.mrb[4].mxu1 %v659_v43 }
 0x159   :  { %624 = vmatprep.mubr.bf16.mxu1 %v660_v44 }
 0x160   :  { %625 = vmatmul.mubr.bf16.gmra.mrb[8].mxu1 %v661_v45 }
 0x161   :  { %628 = vmatprep.mubr.bf16.mxu1 %v662_v46 }
 0x168   :  { %629 = vmatmul.mubr.bf16.gmra.mrb[12].mxu1 %v663_v47 }
 0x223   :  { %v618_v49 = vpop.f32.mrb[0].mxu1 }
 0x224   :  { %v407_v50 = vadd.f32 %v618_v49, %v527_v48  ;;  %v398_v51 = vpop.f32.mrb[1].mxu1 }
 0x225   :  { %v399_v52 = vadd.f32 %v527_v48, %v398_v51  ;;  %v619_v53 = vpop.f32.mrb[2].mxu1 }
 0x226   :  { %v463_v54 = vmax.f32 %v407_v50, 0.0  ;;  %v410_v55 = vadd.f32 %v619_v53, %v527_v48  ;;  %v401_v56 = vpop.f32.mrb[3].mxu1 }
 0x227   :  { %v461_v57 = vmax.f32 %v399_v52, 0.0  ;;  %v402_v58 = vadd.f32 %v527_v48, %v401_v56 }
 0x228   :  { %479 = vst [vmem:[#allocation8 + $0x10] sm:$0xff] %v463_v54  ;;  %v464_v59 = vmax.f32 %v410_v55, 0.0 }
 0x229   :  { %477 = vst [vmem:[#allocation8] sm:$0xff] %v461_v57  ;;  %v462_v60 = vmax.f32 %v402_v58, 0.0 }
 0x22a   :  { %480 = vst [vmem:[#allocation8 + $0x18] sm:$0xff] %v464_v59 }
 0x22b   :  { %478 = vst [vmem:[#allocation8 + $0x8] sm:$0xff] %v462_v60  ;;  %v622_v61 = vpop.f32.mrb[4].mxu1 }
 0x22c   :  { %v423_v62 = vadd.f32 %v622_v61, %v527_v48  ;;  %v414_v63 = vpop.f32.mrb[5].mxu1 }
 0x22d   :  { %v415_v0 = vadd.f32 %v527_v48, %v414_v63  ;;  %v623_v1 = vpop.f32.mrb[6].mxu1 }
 0x22e   :  { %v467_v2 = vmax.f32 %v423_v62, 0.0  ;;  %v426_v3 = vadd.f32 %v623_v1, %v527_v48  ;;  %v417_v4 = vpop.f32.mrb[7].mxu1 }
 0x22f   :  { %v465_v5 = vmax.f32 %v415_v0, 0.0  ;;  %v418_v6 = vadd.f32 %v527_v48, %v417_v4 }
 0x230   :  { %483 = vst [vmem:[#allocation8 + $0x30] sm:$0xff] %v467_v2  ;;  %v468_v7 = vmax.f32 %v426_v3, 0.0 }
 0x231   :  { %481 = vst [vmem:[#allocation8 + $0x20] sm:$0xff] %v465_v5  ;;  %v466_v8 = vmax.f32 %v418_v6, 0.0 }
 0x232   :  { %484 = vst [vmem:[#allocation8 + $0x38] sm:$0xff] %v468_v7 }
 0x233   :  { %482 = vst [vmem:[#allocation8 + $0x28] sm:$0xff] %v466_v8  ;;  %v626_v9 = vpop.f32.mrb[8].mxu1 }
 0x234   :  { %v439_v10 = vadd.f32 %v626_v9, %v527_v48  ;;  %v430_v11 = vpop.f32.mrb[9].mxu1 }
 0x235   :  { %v431_v12 = vadd.f32 %v527_v48, %v430_v11  ;;  %v627_v13 = vpop.f32.mrb[10].mxu1 }
 0x236   :  { %v471_v14 = vmax.f32 %v439_v10, 0.0  ;;  %v442_v15 = vadd.f32 %v627_v13, %v527_v48  ;;  %v433_v16 = vpop.f32.mrb[11].mxu1 }
 0x237   :  { %v469_v17 = vmax.f32 %v431_v12, 0.0  ;;  %v434_v18 = vadd.f32 %v527_v48, %v433_v16 }
 0x238   :  { %487 = vst [vmem:[#allocation8 + $0x50] sm:$0xff] %v471_v14  ;;  %v472_v19 = vmax.f32 %v442_v15, 0.0 }
 0x239   :  { %485 = vst [vmem:[#allocation8 + $0x40] sm:$0xff] %v469_v17  ;;  %v470_v20 = vmax.f32 %v434_v18, 0.0 }
 0x23a   :  { %488 = vst [vmem:[#allocation8 + $0x58] sm:$0xff] %v472_v19 }
 0x23b   :  { %486 = vst [vmem:[#allocation8 + $0x48] sm:$0xff] %v470_v20  ;;  %v630_v21 = vpop.f32.mrb[12].mxu1 }
 0x23c   :  { %v455_v22 = vadd.f32 %v630_v21, %v527_v48  ;;  %v446_v23 = vpop.f32.mrb[13].mxu1 }
 0x23d   :  { %v447_v24 = vadd.f32 %v527_v48, %v446_v23  ;;  %v631_v25 = vpop.f32.mrb[14].mxu1 }
 0x23e   :  { %v475_v26 = vmax.f32 %v455_v22, 0.0  ;;  %v458_v27 = vadd.f32 %v631_v25, %v527_v48  ;;  %v449_v28 = vpop.f32.mrb[15].mxu1 }
 0x23f   :  { %v473_v29 = vmax.f32 %v447_v24, 0.0  ;;  %v450_v30 = vadd.f32 %v527_v48, %v449_v28 }
 0x240   :  { %491 = vst [vmem:[#allocation8 + $0x70] sm:$0xff] %v475_v26  ;;  %v476_v31 = vmax.f32 %v458_v27, 0.0 }
 0x241   :  { %489 = vst [vmem:[#allocation8 + $0x60] sm:$0xff] %v473_v29  ;;  %v474_v32 = vmax.f32 %v450_v30, 0.0 }
 0x242   :  { %492 = vst [vmem:[#allocation8 + $0x78] sm:$0xff] %v476_v31 }
 0x243   :  { %490 = vst [vmem:[#allocation8 + $0x68] sm:$0xff] %v474_v32 }
 0x244   :  { %741 = shalt.err (!%p738_p0)
}
 0x245   :  { %s742_s30 = scalar_lea.hbm %s862_s4, 2048 }
 0x246   :  { %p743_p1 = scmp.ne.s32.totalorder %s862_s4, %s742_s30  ;;  %p746_p2 = scmp.lt.u32.totalorder %s742_s30, %s862_s4 }
 0x248   :  { %p748_p3 = pnand %p746_p2, %p743_p1 }
 0x24a   :  { %751 = shalt.err (!%p748_p3)
}
 0x24b   :  { %s764_s9 = smov 128   ;;  %s765_s10 = smov 8  }
 0x24c   :  { %504 = dma.vmem_to_hbm [thread:$0]  %s499_s26, 2048, %s862_s4, [#allocation4], %s764_s9, %s764_s9, %s765_s10  }
 0x24d   :  { %756 = dma.done.wait [#allocation4], 2048  }
 0x24e   :  { %757 = vsyncadd [#allocation4], 4294965248 }
 0x24f   :  { %508 = vsyncpa [#allocation3], 1 }
 0x250   :  { %509 = vsyncpa [#allocation6], 1 }
 0x251   :  { %510 = vsyncpa [#allocation4], 1 }

</bundles_post_ra>
